<compile_context>
chip_gen: v5e
topology: v5e:2x2
jax: 0.10.0
libtpu: 0.0.40
codegen_flags: <defaults>
</compile_context>

<pallas_src>
import functools

import jax
import jax.numpy as jnp
from jax.experimental import pallas as pl
from jax.experimental.pallas import tpu as pltpu


# ----------------------------- Pallas kernel ------------------------------ #
def _fused_readout_kernel(x_ref, w_ref, b_ref, o_ref):
    # x: (tm, K), w: (K, Np), b: (1, Np) -> o: (tm, Np); Np multiple of 128.
    acc = jnp.dot(x_ref[...], w_ref[...], preferred_element_type=jnp.float32)
    o_ref[...] = acc + b_ref[...]


def fused_readout(x2d: jnp.ndarray, w_fused: jnp.ndarray, b_fused: jnp.ndarray,
                  *, tm: int = 2048) -> jnp.ndarray:
    """y = x2d @ w_fused + b_fused in a single Pallas call.

    w_fused: (K, Np) with Np a multiple of 128 (zero-padded columns).
    Small M (<= tm): one resident block, no grid.
    Large M: tile only M with grid = cdiv(M, tm); the partial last block is
    handled by Pallas' boundary masking (no wrapper-side pad / slice), and the
    small fused weight/bias stay VMEM-resident across all grid steps.
    `tm` must be a multiple of 8; sweep per generation (v5e: keep <= 4096 or
    raise vmem_limit_bytes; v7x has only 64 MiB physical VMEM).
    """
    M, K = x2d.shape
    Kw, Np = w_fused.shape
    assert K == Kw and Np % 128 == 0 and tm % 8 == 0
    b2d = b_fused.reshape(1, Np)

    cost = pl.CostEstimate(
        flops=2 * M * K * Np,
        transcendentals=0,
        bytes_accessed=4 * (M * K + K * Np + M * Np),
    )

    if M <= tm:
        # Gridless: every operand is one full VMEM-resident block.
        return pl.pallas_call(
            _fused_readout_kernel,
            out_shape=jax.ShapeDtypeStruct((M, Np), jnp.float32),
            in_specs=[pl.BlockSpec(memory_space=pltpu.MemorySpace.VMEM)] * 3,
            out_specs=pl.BlockSpec(memory_space=pltpu.MemorySpace.VMEM),
            cost_estimate=cost,
        )(x2d, w_fused, b2d)

    # Scaling path: stream M in tiles of `tm` rows.  No padding of x and no
    # output slice: grid covers ceil(M/tm) blocks and Pallas masks the tail.
    return pl.pallas_call(
        _fused_readout_kernel,
        out_shape=jax.ShapeDtypeStruct((M, Np), jnp.float32),
        grid=(pl.cdiv(M, tm),),
        in_specs=[
            pl.BlockSpec((tm, K), lambda i: (i, 0)),
            pl.BlockSpec((K, Np), lambda i: (0, 0)),   # VMEM-resident weight
            pl.BlockSpec((1, Np), lambda i: (0, 0)),   # VMEM-resident bias
        ],
        out_specs=pl.BlockSpec((tm, Np), lambda i: (i, 0)),
        compiler_params=pltpu.CompilerParams(
            dimension_semantics=("parallel",)),
        cost_estimate=cost,
    )(x2d, w_fused, b2d)


# ------------------------------ Model (JAX) -------------------------------- #
def init_model_params(key,
                      pred_slot_dimensionality: int,
                      gt_continuous_slot_dimensionality,
                      gt_num_categories):
    """Per-head Linear params (same semantics as PyTorch nn.Linear heads).

    Weights stored as (D, out) so the kernel does x @ W (== x @ W_pt.T)."""
    params = {"cont": None, "cat": []}
    n_cat = 0 if gt_num_categories is None else len(gt_num_categories)
    keys = jax.random.split(key, 2 + 2 * n_cat)
    if gt_continuous_slot_dimensionality is not None:
        w = jax.random.normal(
            keys[0], (pred_slot_dimensionality, gt_continuous_slot_dimensionality),
            dtype=jnp.float32) * 0.05
        b = jax.random.normal(
            keys[1], (gt_continuous_slot_dimensionality,), dtype=jnp.float32) * 0.05
        params["cont"] = (w, b)
    if gt_num_categories is not None:
        for idx, nc in enumerate(gt_num_categories):
            w = jax.random.normal(
                keys[2 + 2 * idx], (pred_slot_dimensionality, nc),
                dtype=jnp.float32) * 0.05
            b = jax.random.normal(
                keys[3 + 2 * idx], (nc,), dtype=jnp.float32) * 0.05
            params["cat"].append((w, b))
    return params


def fuse_params(params):
    """Concatenate all heads along the output axis and pad to a multiple of
    128 lanes (zero columns) so the kernel output is lane-dense.

    Returns (w_fused, b_fused, meta) where meta is STATIC Python data (do not
    pass meta through jit as a traced argument)."""
    heads = []
    if params["cont"] is not None:
        heads.append(params["cont"])
    heads.extend(params["cat"])
    assert heads, "Model must have at least one readout head."

    ws = [w for (w, _) in heads]
    bs = [b for (_, b) in heads]
    widths = [int(w.shape[1]) for w in ws]
    n_total = sum(widths)
    n_pad = ((n_total + 127) // 128) * 128

    w_fused = jnp.concatenate(ws, axis=1)
    b_fused = jnp.concatenate(bs, axis=0)
    if n_pad > n_total:
        w_fused = jnp.pad(w_fused, ((0, 0), (0, n_pad - n_total)))
        b_fused = jnp.pad(b_fused, ((0, n_pad - n_total),))

    offsets = []
    off = 0
    for width in widths:
        offsets.append((off, width))
        off += width

    meta = {
        "offsets": tuple(offsets),
        "has_cont": params["cont"] is not None,
        "n_cat": len(params["cat"]),
    }
    return w_fused, b_fused, meta


def make_model_forward(meta, *, tm: int = 2048):
    """Build the forward fn (equivalent of Model.forward, share_readout=True).

    Static head structure (meta) is closed over; returned fn takes only
    arrays, so it is safe to jax.jit directly.
    """
    offsets = meta["offsets"]
    has_cont = meta["has_cont"]
    n_cat = meta["n_cat"]

    def forward(x, w_fused, b_fused):
        # x: (bs, ns, pred_slot_dim)
        bs, ns, d = x.shape
        x2 = x.reshape(bs * ns, d)

        out = fused_readout(x2, w_fused, b_fused, tm=tm)

        idx = 0
        y = None
        if has_cont:
            off, width = offsets[idx]
            idx += 1
            y = out[:, off:off + width].reshape(bs, ns, width)

        ps = None
        if n_cat > 0:
            ps = []
            for off, width in offsets[idx:]:
                ps.append(out[:, off:off + width].reshape(bs, ns, width))

        return y, ps

    return forward
    # TODO(synk): non-shared readout branch raises NotImplementedError in the
    # reference module and is intentionally not implemented.


# --------------------------------- main ------------------------------------ #
if __name__ == "__main__":
    # Small, forward-consistent shapes.
    bs = 2                       # batch
    n_slots = 4                  # ns
    pred_slot_dim = 32           # D
    gt_cont_dim = 3              # continuous variables per slot
    gt_num_categories = [5, 7]   # two categorical variables

    key = jax.random.PRNGKey(0)
    k_x, k_p, k_big = jax.random.split(key, 3)

    x = jax.random.normal(k_x, (bs, n_slots, pred_slot_dim), dtype=jnp.float32)
    params = init_model_params(k_p, pred_slot_dim, gt_cont_dim, gt_num_categories)
    w_fused, b_fused, meta = fuse_params(params)

    fwd = jax.jit(make_model_forward(meta))
    y, ps = fwd(x, w_fused, b_fused)
    jax.block_until_ready(y)
    for p in ps:
        jax.block_until_ready(p)

    # Reference check against plain-JAX math (same semantics as PyTorch Linear).
    x2 = x.reshape(bs * n_slots, pred_slot_dim)
    w_c, b_c = params["cont"]
    y_ref = (x2 @ w_c + b_c).reshape(bs, n_slots, -1)
    assert y.shape == (bs, n_slots, gt_cont_dim)
    assert jnp.allclose(y, y_ref, atol=1e-5, rtol=1e-5)
    for (w, b), p, nc in zip(params["cat"], ps, gt_num_categories):
        p_ref = (x2 @ w + b).reshape(bs, n_slots, -1)
        assert p.shape == (bs, n_slots, nc)
        assert jnp.allclose(p, p_ref, atol=1e-5, rtol=1e-5)

    # Also exercise the scaling (gridded, partial-last-block) path:
    # M = 300 rows with tm = 128 -> grid of 3 blocks, last block masked.
    M_big = 300
    x_big = jax.random.normal(k_big, (M_big, pred_slot_dim), dtype=jnp.float32)
    out_big = jax.jit(
        functools.partial(fused_readout, tm=128))(x_big, w_fused, b_fused)
    jax.block_until_ready(out_big)
    ref_big = x_big @ w_fused + b_fused
    assert out_big.shape == (M_big, w_fused.shape[1])
    assert jnp.allclose(out_big, ref_big, atol=1e-5, rtol=1e-5)

    print("KERNEL_OK")
</pallas_src>

<mosaic_0001>
module attributes {stable_mosaic.version = 11 : i64} {
  func.func @_fused_readout_kernel(%arg0: memref<8x32xf32, #tpu.memory_space<vmem>>, %arg1: memref<32x128xf32, #tpu.memory_space<vmem>>, %arg2: memref<1x128xf32, #tpu.memory_space<vmem>>, %arg3: memref<8x128xf32, #tpu.memory_space<vmem>>) attributes {dimension_semantics = [], scalar_prefetch = 0 : i64, scratch_operands = 0 : i64, tpu.core_type = #tpu.core_type<tc>} {
    %c0 = arith.constant 0 : index
    %c0_0 = arith.constant 0 : index
    %0 = vector.load %arg0[%c0, %c0_0] : memref<8x32xf32, #tpu.memory_space<vmem>>, vector<8x32xf32>
    %c0_1 = arith.constant 0 : index
    %c0_2 = arith.constant 0 : index
    %1 = vector.load %arg1[%c0_1, %c0_2] : memref<32x128xf32, #tpu.memory_space<vmem>>, vector<32x128xf32>
    %cst = arith.constant dense<0.000000e+00> : vector<8x128xf32>
    %2 = tpu.matmul %0, %1, %cst {dimension_numbers = #tpu.dot_dimension_numbers<[1], [0], [0], [1], [0, 0, 1, 1], [], []>} : vector<8x32xf32>, vector<32x128xf32>, vector<8x128xf32> -> vector<8x128xf32>
    %c0_3 = arith.constant 0 : index
    %c0_4 = arith.constant 0 : index
    %3 = vector.load %arg2[%c0_3, %c0_4] : memref<1x128xf32, #tpu.memory_space<vmem>>, vector<1x128xf32>
    %4 = vector.broadcast %3 : vector<1x128xf32> to vector<8x128xf32>
    %5 = arith.addf %2, %4 : vector<8x128xf32>
    %c0_5 = arith.constant 0 : index
    %c0_6 = arith.constant 0 : index
    %6 = vector.load %arg3[%c0_5, %c0_6] : memref<8x128xf32, #tpu.memory_space<vmem>>, vector<8x128xf32>
    tpu.vector_store %arg3[%c0_5, %c0_6], %5 {strides = array<i32>} : memref<8x128xf32, #tpu.memory_space<vmem>>, vector<8x128xf32>,
    return
  }
}

</mosaic_0001>

<bundles_post_ra>
// kernel: forward.1
= control target key start
LH: loop header
LB: loop body
LE: loop exit
PB: predicated region body
PF: predicated region fallthrough
CT: control target
= control target key end

     0   :  { %8 = vsyncpa [#allocation3], 0  ;;  %s178_s0 = inlined_call_operand.hbm [shape: f32[8,32], index: 0, kind: input, shape index: {}]   ;;  %s179_s1 = inlined_call_operand.hbm [shape: f32[32,128], index: 1, kind: input, shape index: {}]   ;;  %s180_s2 = inlined_call_operand.vmem [shape: f32[1,128], index: 2, kind: input, shape index: {}]   ;;  %s181_s3 = inlined_call_operand.vmem [shape: f32[8,128], index: 3, kind: output, shape index: {}]  }
   0x1   :  { %s15_s14 = sshll.u32 %s178_s0, 4  ;;  %s16_s14 = int_to_ptr.hbm [resolvable:$true] %s15_s14 }
   0x2   :  { %9 = vsyncpa [#allocation5], 0  ;;  %s142_s15 = smov [#allocation2]   ;;  %s25_s19 = sshll.u32 %s179_s1, 4  ;;  %s26_s19 = int_to_ptr.hbm [resolvable:$true] %s25_s19 }
   0x3   :  { %s17_s16 = sshll.u32 %s142_s15, 4  ;;  %s143_s20 = smov [#allocation4]   ;;  %s18_s16 = int_to_ptr.vmem [resolvable:$true] %s17_s16 }
   0x4   :  { %20 = dma.hbm_to_vmem [thread:$0]  %s16_s14, 128, %s18_s16, [#allocation3]  }
   0x5   :  { %s27_s21 = sshll.u32 %s143_s20, 4  ;;  %s144_s22 = smov 128   ;;  %s28_s21 = int_to_ptr.vmem [resolvable:$true] %s27_s21 }
   0x6   :  { %s145_s23 = smov 8  }
   0x7   :  { %33 = dma.hbm_to_vmem [thread:$0]  %s26_s19, 512, %s28_s21, [#allocation5], %s144_s22, %s144_s22, %s145_s23  }
   0x8   :  { %138 = dma.done.wait [#allocation3], 128  }
   0x9   :  { %139 = vsyncadd [#allocation3], 4294967168 }
   0xa   :  { %140 = dma.done.wait [#allocation5], 512  }
   0xb   :  { %141 = vsyncadd [#allocation5], 4294966784  ;;  %v48_v0 = vld [vmem:[#allocation4 + $0x18] sm:$0xff]  ;;  %v47_v1 = vld [vmem:[#allocation4 + $0x10] sm:$0xff]  ;;  %vm53_vm0 = vcmask 261120  }
   0xc   :  { %69 = vmatpush.msra.mxu0 %v48_v0  ;;  %v46_v2 = vld [vmem:[#allocation4 + $0x8] sm:$0xff]  ;;  %v45_v3 = vld [vmem:[#allocation4] sm:$0xff]  ;;  %v44_v4 = vld [vmem:[#allocation2] sm:$0xff] }
   0xd   :  { %v89_v5 = vld [vmem:[%s180_s2] ss:$0 sm:$0xff] }
   0xe   :  { %70 = vmatpush.msra.mxu0 %v47_v1 }
  0x10   :  { %71 = vmatpush.msra.mxu0 %v46_v2 }
  0x12   :  { %72 = vmatpush.msra.mxu0 %v45_v3 }
  0x13   :  { %84 = vmatmul.msk.f32.vlgmr.msra.gmra.mxu0 %vm53_vm0, %v44_v4 }
  0x90   :  { %v74_v6 = vpop.f32.mrf.mxu0 }
  0x91   :  { %v75_v7 = vadd.f32 %v89_v5, %v74_v6 }
  0x93   :  { %77 = vst [vmem:[%s181_s3] sm:$0xff] %v75_v7 }
  0x94   :  { %82 = vsyncpa [#allocation3], 1 }
  0x95   :  { %83 = vsyncpa [#allocation5], 1 }

</bundles_post_ra>
